<compile_context>
chip_gen: v7x
topology: tpu7x:2x2x1
jax: 0.10.0
libtpu: 0.0.40
codegen_flags: <defaults>
</compile_context>

<pallas_src>
import jax
import jax.numpy as jnp
from jax.experimental import pallas as pl
from jax.experimental.pallas import tpu as pltpu


_TARGET_TILE_BYTES = 4 << 20       # per-buffer tile byte budget (~4 MiB)
_MAX_LANE_TILE = 32768             # lane-tile cap (multiple of 128)
_ROW_TILE_CAP = 256                # row-tile cap for the broadcast path
_XLA_FALLBACK_BYTES = 256 * 1024   # below this, plain XLA add wins
_MEGACORE_MIN_BYTES = 1 << 20      # only split for >=1 MiB of work


def _sublane_unit(dtype) -> int:
    return {4: 8, 2: 16, 1: 32}.get(jnp.dtype(dtype).itemsize, 8)


def _vmem_limit_bytes(working_set_bytes: int) -> int:
    """Scoped-VMEM request sized to the working set, with headroom vs physical."""
    try:
        cap = int(pltpu.get_tpu_info().vmem_capacity_bytes)
    except Exception:
        cap = 64 << 20  # conservative default (v7x per-TC VMEM)
    want = max(32 << 20, 2 * working_set_bytes)
    return int(min(want, (cap * 3) // 4))


def _add_kernel(x_ref, emb_ref, o_ref):
    # emb_ref is (1, lane_tile) on the broadcast path (VPU broadcasts over the
    # sublane axis) or (row_tile, lane_tile) on the folded path.
    o_ref[...] = x_ref[...] + emb_ref[...]


def _pos_enc_broadcast(x2d, emb2d, donate_x):
    """x2d: [R, L]; emb2d: [1, L] added (broadcast) to every row."""
    R, L = x2d.shape
    itemsize = jnp.dtype(x2d.dtype).itemsize

    # Rows first, then lanes fill the per-buffer byte budget.
    row_tile = R if R <= _ROW_TILE_CAP else _ROW_TILE_CAP
    lane_cap = max(128, min(_MAX_LANE_TILE,
                            (_TARGET_TILE_BYTES // (row_tile * itemsize)) // 128 * 128))
    lane_tile = L if L <= lane_cap else lane_cap

    row_blocks = pl.cdiv(R, row_tile)
    lane_blocks = pl.cdiv(L, lane_tile)

    # v7x megacore: guarantee >=2 blocks when the work is non-trivial.
    if (row_blocks * lane_blocks == 1 and R * L * itemsize >= _MEGACORE_MIN_BYTES
            and L >= 256):
        lane_tile = max(128, (((L + 1) // 2 + 127) // 128) * 128)
        lane_blocks = pl.cdiv(L, lane_tile)

    tile_bytes = row_tile * lane_tile * itemsize
    emb_bytes = lane_tile * itemsize
    working_set = 2 * (2 * tile_bytes + emb_bytes)  # double-buffered x, out, emb

    return pl.pallas_call(
        _add_kernel,
        out_shape=jax.ShapeDtypeStruct((R, L), x2d.dtype),
        grid_spec=pltpu.PrefetchScalarGridSpec(
            num_scalar_prefetch=0,
            grid=(lane_blocks, row_blocks),          # rows innermost
            in_specs=[
                pl.BlockSpec((row_tile, lane_tile), lambda j, i: (i, j)),
                # emb depends only on the outer lane axis -> resident across
                # all inner row steps (read from HBM once per lane tile).
                pl.BlockSpec((1, lane_tile), lambda j, i: (0, j)),
            ],
            out_specs=pl.BlockSpec((row_tile, lane_tile), lambda j, i: (i, j)),
        ),
        compiler_params=pltpu.CompilerParams(
            dimension_semantics=("parallel", "parallel"),
            vmem_limit_bytes=_vmem_limit_bytes(working_set),
        ),
        input_output_aliases=({0: 0} if donate_x else {}),
    )(x2d, emb2d)


def _pos_enc_folded(x2d, emb2d, batch, donate_x):
    """x2d: [B*E, L] (rows ordered (b, e)); emb2d: [E, L]; row r uses emb row r % E.

    Caller guarantees: L % 128 == 0, E % sublane_unit == 0, x2d rows == batch * E.
    """
    R, L = x2d.shape
    E = emb2d.shape[0]
    itemsize = jnp.dtype(x2d.dtype).itemsize
    sub = _sublane_unit(x2d.dtype)

    # Lanes are naturally bounded by L (= k*D, multiple of 128); rows fill the
    # remaining byte budget with a divisor of E so a row block never straddles
    # two sequences (keeps the emb index_map a pure block index).
    lane_tile = L if L <= _MAX_LANE_TILE else (_MAX_LANE_TILE // 128) * 128
    max_rows = max(sub, _TARGET_TILE_BYTES // (lane_tile * itemsize))
    row_tile = min(E, (max_rows // sub) * sub)
    while row_tile > sub and E % row_tile != 0:
        row_tile -= sub
    if E % row_tile != 0:
        row_tile = sub  # sub divides E by construction

    eb = E // row_tile
    lane_blocks = pl.cdiv(L, lane_tile)

    # v7x megacore: split rows if everything collapsed into one block.
    if (lane_blocks * eb * batch == 1 and R * L * itemsize >= _MEGACORE_MIN_BYTES
            and row_tile >= 2 * sub):
        t = (row_tile // 2 // sub) * sub
        while t >= sub and E % t != 0:
            t -= sub
        if t >= sub:
            row_tile = t
            eb = E // row_tile

    tile_bytes = row_tile * lane_tile * itemsize
    working_set = 2 * 3 * tile_bytes  # double-buffered x, out, emb tiles

    # Batch innermost so the emb tile stays resident across it (emb read from
    # HBM exactly once).  It only needs to be a parallel axis when it is the
    # sole source of parallelism.
    last_sem = "parallel" if (lane_blocks * eb == 1 and batch > 1) else "arbitrary"

    return pl.pallas_call(
        _add_kernel,
        out_shape=jax.ShapeDtypeStruct((R, L), x2d.dtype),
        grid_spec=pltpu.PrefetchScalarGridSpec(
            num_scalar_prefetch=0,
            grid=(lane_blocks, eb, batch),           # batch innermost
            in_specs=[
                pl.BlockSpec((row_tile, lane_tile),
                             lambda j, i, b, _eb=eb: (b * _eb + i, j)),
                pl.BlockSpec((row_tile, lane_tile), lambda j, i, b: (i, j)),
            ],
            out_specs=pl.BlockSpec((row_tile, lane_tile),
                                   lambda j, i, b, _eb=eb: (b * _eb + i, j)),
        ),
        compiler_params=pltpu.CompilerParams(
            dimension_semantics=("parallel", "parallel", last_sem),
            vmem_limit_bytes=_vmem_limit_bytes(working_set),
        ),
        input_output_aliases=({0: 0} if donate_x else {}),
    )(x2d, emb2d)


def _choose_fold(S, D, sub):
    """Smallest k dividing S with (k*D) % 128 == 0 and (S//k) a usable multiple
    of the sublane unit; None if no such k exists."""
    for k in range(1, S + 1):
        if S // k < sub:
            break
        if S % k:
            continue
        E = S // k
        if (k * D) % 128 == 0 and E % sub == 0:
            return k
    return None


def positional_encoding(x, emb_table, batched=True, donate_x=False,
                        min_pallas_bytes=_XLA_FALLBACK_BYTES):
    """Pallas equivalent of PositionalEncoding.forward.

    x:         [B, S, D] if batched else [S, D]
    emb_table: [num_positions, D]  (the nn.Embedding weight)
    """
    if not batched:
        return positional_encoding(x[None, ...], emb_table, batched=True,
                                   donate_x=donate_x,
                                   min_pallas_bytes=min_pallas_bytes)[0]

    B, S, D = x.shape
    num_positions = emb_table.shape[0]
    assert S <= num_positions, (
        f"seq_len ({S}) exceeds num_positions ({num_positions}) of the "
        "positional embedding table")

    # nn.Embedding lookup of indices range(S) is just a contiguous slice.
    emb = emb_table[:S, :].astype(x.dtype)

    itemsize = jnp.dtype(x.dtype).itemsize
    if B * S * D * itemsize < min_pallas_bytes:
        # Launch/DMA setup overhead dominates at this size on every generation.
        return x + emb[None, :, :]

    sub = _sublane_unit(x.dtype)
    if B >= sub:
        # Batch fills the sublanes; lane-dense [B, S*D] slab with emb broadcast.
        out2d = _pos_enc_broadcast(x.reshape(B, S * D), emb.reshape(1, S * D),
                                   donate_x)
        return out2d.reshape(B, S, D)

    k = _choose_fold(S, D, sub)
    if k is not None:
        # Small batch: fold S/k positions into the row axis for full sublane
        # occupancy and 128-multiple lane stores.
        E = S // k
        out2d = _pos_enc_folded(x.reshape(B * E, k * D), emb.reshape(E, k * D),
                                B, donate_x)
        return out2d.reshape(B, S, D)

    # Fallback: lane-dense broadcast layout even at low sublane occupancy.
    out2d = _pos_enc_broadcast(x.reshape(B, S * D), emb.reshape(1, S * D),
                               donate_x)
    return out2d.reshape(B, S, D)


if __name__ == "__main__":
    key = jax.random.PRNGKey(0)
    keys = jax.random.split(key, 8)

    # --- Module nominal config: d_model=32, num_positions=20, batched=True ---
    d_model, num_positions, batch, seq_len = 32, 20, 2, 8
    x = jax.random.normal(keys[0], (batch, seq_len, d_model), dtype=jnp.float32)
    emb_table = jax.random.normal(keys[1], (num_positions, d_model), dtype=jnp.float32)
    ref = x + emb_table[:seq_len, :][None, :, :]

    # Force the Pallas kernel (broadcast/fallback path) even at this tiny size.
    out = jax.block_until_ready(positional_encoding(x, emb_table, batched=True,
                                                    min_pallas_bytes=0))
    assert out.shape == x.shape
    assert jnp.allclose(out, ref, atol=1e-6), "batched kernel mismatch"

    # Default wrapper (XLA fast path at this size) must agree too.
    out_fast = jax.block_until_ready(positional_encoding(x, emb_table, batched=True))
    assert jnp.allclose(out_fast, ref, atol=1e-6), "fast-path mismatch"

    # Unbatched path.
    xu = x[0]
    out_u = jax.block_until_ready(positional_encoding(xu, emb_table, batched=False,
                                                      min_pallas_bytes=0))
    assert jnp.allclose(out_u, xu + emb_table[:seq_len, :], atol=1e-6), "unbatched mismatch"

    # --- Folded path (small batch, D*k multiple of 128): B=4, S=64, D=64 ---
    x2 = jax.random.normal(keys[2], (4, 64, 64), dtype=jnp.float32)
    t2 = jax.random.normal(keys[3], (64, 64), dtype=jnp.float32)
    out2 = jax.block_until_ready(positional_encoding(x2, t2, batched=True,
                                                     min_pallas_bytes=0))
    assert jnp.allclose(out2, x2 + t2[None, :, :], atol=1e-6), "folded path mismatch"

    # --- Broadcast path with batch >= sublane unit: B=8, S=16, D=48 ---
    x3 = jax.random.normal(keys[4], (8, 16, 48), dtype=jnp.float32)
    t3 = jax.random.normal(keys[5], (16, 48), dtype=jnp.float32)
    out3 = jax.block_until_ready(positional_encoding(x3, t3, batched=True,
                                                     min_pallas_bytes=0))
    assert jnp.allclose(out3, x3 + t3[None, :, :], atol=1e-6), "broadcast path mismatch"

    # --- bf16 folded path: B=2, S=32, D=64 ---
    x4 = jax.random.normal(keys[6], (2, 32, 64), dtype=jnp.bfloat16)
    t4 = jax.random.normal(keys[7], (32, 64), dtype=jnp.bfloat16)
    out4 = jax.block_until_ready(positional_encoding(x4, t4, batched=True,
                                                     min_pallas_bytes=0))
    ref4 = (x4.astype(jnp.float32) + t4.astype(jnp.float32)[None, :, :]).astype(jnp.bfloat16)
    assert jnp.allclose(out4.astype(jnp.float32), ref4.astype(jnp.float32),
                        atol=2e-2), "bf16 folded path mismatch"

    print("KERNEL_OK")
</pallas_src>

<mosaic_0001>
module attributes {stable_mosaic.version = 11 : i64} {
  func.func @_add_kernel(%arg0: i32, %arg1: i32, %arg2: memref<2x256xf32, #tpu.memory_space<vmem>>, %arg3: memref<1x256xf32, #tpu.memory_space<vmem>>, %arg4: memref<2x256xf32, #tpu.memory_space<vmem>>) attributes {dimension_semantics = [#tpu.dimension_semantics<parallel>, #tpu.dimension_semantics<parallel>], iteration_bounds = array<i64: 1, 1>, scalar_prefetch = 0 : i64, scratch_operands = 0 : i64, tpu.core_type = #tpu.core_type<tc>, window_params = [{transform_indices = @transform_0, window_bounds = array<i64: 2, 256>}, {transform_indices = @transform_1, window_bounds = array<i64: 1, 256>}, {transform_indices = @transform_2, window_bounds = array<i64: 2, 256>}]} {
    %c0 = arith.constant 0 : index
    %c0_0 = arith.constant 0 : index
    %0 = vector.load %arg2[%c0, %c0_0] : memref<2x256xf32, #tpu.memory_space<vmem>>, vector<2x256xf32>
    %c0_1 = arith.constant 0 : index
    %c0_2 = arith.constant 0 : index
    %1 = vector.load %arg3[%c0_1, %c0_2] : memref<1x256xf32, #tpu.memory_space<vmem>>, vector<1x256xf32>
    %2 = vector.broadcast %1 : vector<1x256xf32> to vector<2x256xf32>
    %3 = arith.addf %0, %2 : vector<2x256xf32>
    %c0_3 = arith.constant 0 : index
    %c0_4 = arith.constant 0 : index
    %4 = vector.load %arg4[%c0_3, %c0_4] : memref<2x256xf32, #tpu.memory_space<vmem>>, vector<2x256xf32>
    tpu.vector_store %arg4[%c0_3, %c0_4], %3 {strides = array<i32>} : memref<2x256xf32, #tpu.memory_space<vmem>>, vector<2x256xf32>,
    return
  }
  func.func @transform_0(%arg0: i32, %arg1: i32) -> (i32, i32) {
    %c0_i32 = arith.constant 0 : i32
    return %arg1, %arg0 : i32, i32
  }
  func.func @transform_1(%arg0: i32, %arg1: i32) -> (i32, i32) {
    %c0_i32 = arith.constant 0 : i32
    %c0_i32_0 = arith.constant 0 : i32
    return %c0_i32, %arg0 : i32, i32
  }
  func.func @transform_2(%arg0: i32, %arg1: i32) -> (i32, i32) {
    %c0_i32 = arith.constant 0 : i32
    return %arg1, %arg0 : i32, i32
  }
}

</mosaic_0001>

<bundles_post_ra>
// kernel: tpu_custom_call.1
= control target key start
LH: loop header
LB: loop body
LE: loop exit
PB: predicated region body
PF: predicated region fallthrough
CT: control target
= control target key end

     0   :  { %7 = vsyncpa [#allocation3], 0  ;;  %s157_s0 = inlined_call_operand.hbm [shape: f32[2,256], index: 0, kind: input, shape index: {}]   ;;  %s158_s1 = inlined_call_operand.vmem [shape: f32[1,256], index: 1, kind: input, shape index: {}]   ;;  %s159_s2 = inlined_call_operand.hbm [shape: f32[2,256], index: 2, kind: output, shape index: {}]  }
   0x1   :  { %8 = vsyncpa [#allocation4], 0  ;;  %s112_s9 = smov [#allocation2]   ;;  %s64_s13 = scalar_lea.hbm %s157_s0, 64 }
   0x2   :  { %s15_s10 = sshll.u32 %s112_s9, 4  ;;  %p65_p0 = scmp.ne.s32.totalorder %s157_s0, %s64_s13  ;;  %s16_s10 = int_to_ptr.vmem [resolvable:$true] %s15_s10 }
   0x3   :  { %p68_p1 = scmp.lt.u32.totalorder %s64_s13, %s157_s0 }
   0x5   :  { %p70_p2 = pnand %p68_p1, %p65_p0 }
   0x7   :  { %73 = shalt.err (!%p70_p2)
}
   0x8   :  { %s74_s18 = scalar_lea.vmem %s16_s10, 64  ;;  %p79_p4 = scmp.lt.s32.totalorder %s16_s10, %s16_s10 }
   0x9   :  { %p75_p3 = scmp.ne.s32.totalorder %s16_s10, %s74_s18  ;;  %p80_p5 = scmp.lt.s32.totalorder %s74_s18, %s74_s18 }
   0xb   :  { %p81_p6 = por %p80_p5, %p79_p4 }
   0xd   :  { %p82_p7 = pnand %p81_p6, %p75_p3 }
   0xf   :  { %85 = shalt.err (!%p82_p7)
}
  0x10   :  { %18 = dma.hbm_to_vmem [thread:$0]  %s157_s0, 64, %s16_s10, [#allocation3]  }
  0x11   :  { %108 = dma.done.wait [#allocation3], 64  }
  0x12   :  { %109 = vsyncadd [#allocation3], 4294967232  ;;  %v27_v0 = vlaneseq  ;;  %v113_v1 = vmov 1983009808   ;;  %v25_v7 = vld [vmem:[%s158_s1] sm:$0x3] }
  0x13   :  { %v37_v2 = vunpack.c.l.s4 %v113_v1  ;;  %v24_v12 = vld [vmem:[#allocation2] sm:$0xf]  ;;  %s114_s23 = smov [#allocation5]  }
  0x14   :  { %v28_v3 = vshrl.u32 %v27_v0, 7  ;;  %s52_s0 = sshll.u32 %s114_s23, 4  ;;  %s53_s0 = int_to_ptr.vmem [resolvable:$true] %s52_s0 }
  0x15   :  { %v38_v6 = vunpack.c.0.s8 %v37_v2  ;;  %s86_s24 = scalar_lea.vmem %s53_s0, 64  ;;  %p91_p9 = scmp.lt.s32.totalorder %s53_s0, %s53_s0 }
  0x16   :  { %v29_v4 = vsub.s32 0, %v28_v3  ;;  %v33_v5 = vsub.s32 1, %v28_v3  ;;  %p87_p8 = scmp.ne.s32.totalorder %s53_s0, %s86_s24  ;;  %p92_p10 = scmp.lt.s32.totalorder %s86_s24, %s86_s24 }
  0x17   :  { %v41_v10 = vsub.s32 %v38_v6, %v28_v3 }
  0x18   :  { %v30_v8 = vrot.slane %v25_v7, %v29_v4  ;;  %v34_v9 = vrot.slane %v25_v7, %v33_v5  ;;  %p93_p11 = por %p92_p10, %p91_p9 }
  0x1a   :  { %v35_v11 = vcombine.low %v30_v8, %v34_v9  ;;  %p94_p12 = pnand %p93_p11, %p87_p8 }
  0x1c   :  { %v42_v13 = vrot.slane %v35_v11, %v41_v10 }
  0x1e   :  { %v44_v14 = vadd.f32 %v42_v13, %v24_v12 }
  0x20   :  { %45 = vst [vmem:[#allocation5] sm:$0xf] %v44_v14 }
  0x21   :  { %97 = shalt.err (!%p94_p12)
}
  0x22   :  { %s98_s26 = scalar_lea.hbm %s159_s2, 64 }
  0x23   :  { %p99_p13 = scmp.ne.s32.totalorder %s159_s2, %s98_s26  ;;  %p102_p0 = scmp.lt.u32.totalorder %s98_s26, %s159_s2 }
  0x25   :  { %p104_p1 = pnand %p102_p0, %p99_p13 }
  0x27   :  { %107 = shalt.err (!%p104_p1)
}
  0x28   :  { %55 = dma.vmem_to_hbm [thread:$0]  %s53_s0, 64, %s159_s2, [#allocation4]  }
  0x29   :  { %110 = dma.done.wait [#allocation4], 64  }
  0x2a   :  { %111 = vsyncadd [#allocation4], 4294967232 }
  0x2b   :  { %59 = vsyncpa [#allocation3], 1 }
  0x2c   :  { %60 = vsyncpa [#allocation4], 1 }

</bundles_post_ra>
